<compile_context>
chip_gen: v7x
topology: tpu7x:2x2x1
jax: 0.10.0
libtpu: 0.0.40
codegen_flags: <defaults>
</compile_context>

<pallas_src>
import functools

import jax
import jax.numpy as jnp
from jax.experimental import pallas as pl
from jax.experimental.pallas import tpu as pltpu


def _round_up(x: int, m: int) -> int:
    return (x + m - 1) // m * m


def _mlp_kernel(*refs, n_layers: int, activation: str):
    """Fused MLP. refs = (x_ref, w0, b0, ..., w_{L-1}, b_{L-1}, out_ref)."""
    x_ref = refs[0]
    out_ref = refs[-1]
    params = refs[1:-1]

    h = x_ref[...].astype(jnp.float32)
    for layer in range(n_layers):
        w = params[2 * layer][...]
        b = params[2 * layer + 1][...].astype(jnp.float32)
        # Cast LHS to the weight dtype (bf16 path uses the MXU's native bf16
        # inputs); accumulate in f32 regardless.
        h = jnp.dot(h.astype(w.dtype), w, preferred_element_type=jnp.float32) + b
        if layer < n_layers - 1:  # no activation after the final Linear
            if activation == "relu":
                h = jnp.maximum(h, 0.0)  # VPU, on the f32 accumulator
            elif activation == "tanh":
                h = jnp.tanh(h)          # EUP, on the f32 accumulator
            # activation == "none": identity (matches nn.Sequential with no act)
    out_ref[...] = h.astype(out_ref.dtype)


def vanilla_mlp_forward(
    x,
    weights,
    biases,
    *,
    activation: str = "relu",
    block_m: int = 512,
    param_dtype=None,
):
    """Run the fused VanillaMLP Pallas kernel.

    x:       (B, input_dim) float32
    weights: list of (in_l, out_l), PyTorch Linear weight transposed
    biases:  list of (out_l,) or (1, out_l)
    param_dtype: optional dtype (e.g. jnp.bfloat16) to cast weights/biases to.
    """
    if activation not in ("relu", "tanh", "none"):
        raise ValueError(f"unsupported activation: {activation!r}")

    B, in_dim = x.shape
    n_layers = len(weights)
    out_dim = weights[-1].shape[1]

    # Normalize / optionally quantize parameters.
    weights = [jnp.asarray(w) for w in weights]
    biases = [jnp.asarray(b).reshape(1, -1) for b in biases]
    if param_dtype is not None:
        weights = [w.astype(param_dtype) for w in weights]
        biases = [b.astype(param_dtype) for b in biases]

    # Lane-dense output: pad the final layer's output dim to a multiple of 128
    # (zero columns), slice the result outside the kernel.
    out_pad = _round_up(out_dim, 128)
    if out_pad != out_dim:
        w_last = weights[-1]
        b_last = biases[-1]
        weights[-1] = jnp.pad(w_last, ((0, 0), (0, out_pad - out_dim)))
        biases[-1] = jnp.pad(b_last, ((0, 0), (0, out_pad - out_dim)))

    # ---- Choose the batch tile under a v7x-safe VMEM budget ----------------
    param_bytes = sum(int(w.size) * w.dtype.itemsize for w in weights) + sum(
        int(b.size) * b.dtype.itemsize for b in biases
    )
    layer_widths = [in_dim] + [w.shape[1] for w in weights]
    widest = max(layer_widths)

    bm = min(_round_up(block_m, 8), _round_up(B, 8))
    bm = max(bm, 8)
    vmem_budget = 48 << 20  # headroom under v7x's 64 MiB physical VMEM per TC
    while True:
        need = (
            param_bytes                      # weights/biases, single-buffered
            + 2 * bm * in_dim * x.dtype.itemsize   # x, double-buffered
            + 2 * bm * out_pad * 4                 # out, double-buffered
            + 2 * bm * widest * 4                  # live f32 activations headroom
        )
        if need <= vmem_budget or bm <= 8:
            break
        bm = max(8, bm // 2)
    block_m = bm
    vmem_limit = int(min(64 << 20, max(32 << 20, 2 * need)))

    # Pad batch to a multiple of block_m (zero rows, sliced off afterwards).
    B_pad = _round_up(B, block_m)
    x_p = jnp.pad(x, ((0, B_pad - B), (0, 0))) if B_pad != B else x

    grid = (B_pad // block_m,)

    # ---- Specs --------------------------------------------------------------
    in_specs = [pl.BlockSpec((block_m, in_dim), lambda i: (i, 0))]
    args = [x_p]
    for w, b in zip(weights, biases):
        # Whole weight / bias resident per grid step; constant index_map =>
        # single-buffer to halve their VMEM footprint.
        in_specs.append(
            pl.BlockSpec(w.shape, lambda i: (0, 0), pipeline_mode=pl.Buffered(1))
        )
        in_specs.append(
            pl.BlockSpec(b.shape, lambda i: (0, 0), pipeline_mode=pl.Buffered(1))
        )
        args.append(w)
        args.append(b)

    out_spec = pl.BlockSpec((block_m, out_pad), lambda i: (i, 0))

    kernel = functools.partial(_mlp_kernel, n_layers=n_layers, activation=activation)

    out = pl.pallas_call(
        kernel,
        out_shape=jax.ShapeDtypeStruct((B_pad, out_pad), jnp.float32),
        grid_spec=pltpu.PrefetchScalarGridSpec(
            num_scalar_prefetch=0,
            grid=grid,
            in_specs=in_specs,
            out_specs=out_spec,
        ),
        compiler_params=pltpu.CompilerParams(
            dimension_semantics=("parallel",),
            vmem_limit_bytes=vmem_limit,
        ),
    )(*args)

    return out[:B, :out_dim]


def init_mlp_params(key, input_dim, hidden_dims, output_dim):
    """Deterministic PyTorch-Linear-style init: U(-1/sqrt(fan_in), 1/sqrt(fan_in))."""
    dims = [input_dim] + list(hidden_dims) + [output_dim]
    weights, biases = [], []
    for i in range(len(dims) - 1):
        fan_in, fan_out = dims[i], dims[i + 1]
        key, kw, kb = jax.random.split(key, 3)
        bound = 1.0 / jnp.sqrt(float(fan_in))
        w = jax.random.uniform(kw, (fan_in, fan_out), jnp.float32, -bound, bound)
        b = jax.random.uniform(kb, (1, fan_out), jnp.float32, -bound, bound)
        weights.append(w)
        biases.append(b)
    return weights, biases


def mlp_reference(x, weights, biases, activation="relu"):
    """Plain-JAX reference of VanillaMLP.forward for correctness checking."""
    h = x
    n = len(weights)
    for i, (w, b) in enumerate(zip(weights, biases)):
        h = h @ w + b.reshape(1, -1)
        if i < n - 1:
            if activation == "relu":
                h = jnp.maximum(h, 0.0)
            elif activation == "tanh":
                h = jnp.tanh(h)
    return h


if __name__ == "__main__":
    # Small shapes consistent with VanillaMLP(input_dim, hidden_dims, output_dim)
    batch = 16
    input_dim = 32
    hidden_dims = [64, 64]
    output_dim = 16
    activation = "relu"

    key = jax.random.PRNGKey(0)
    key, kx = jax.random.split(key)
    x = jax.random.normal(kx, (batch, input_dim), jnp.float32)

    weights, biases = init_mlp_params(key, input_dim, hidden_dims, output_dim)
    ref = mlp_reference(x, weights, biases, activation=activation)

    # f32 path (exact-ish match vs reference)
    out = vanilla_mlp_forward(x, weights, biases, activation=activation)
    out = jax.block_until_ready(out)
    assert out.shape == (batch, output_dim)
    assert jnp.allclose(out, ref, atol=1e-5, rtol=1e-5), "f32 mismatch vs reference"

    # bf16 weight path (MXU-native bf16, f32 accumulation) — looser tolerance.
    out_bf16 = vanilla_mlp_forward(
        x, weights, biases, activation=activation, param_dtype=jnp.bfloat16
    )
    out_bf16 = jax.block_until_ready(out_bf16)
    assert out_bf16.shape == (batch, output_dim)
    assert jnp.allclose(out_bf16, ref, atol=1e-1, rtol=1e-1), "bf16 mismatch vs reference"

    # tanh activation path
    out_tanh = vanilla_mlp_forward(x, weights, biases, activation="tanh")
    out_tanh = jax.block_until_ready(out_tanh)
    ref_tanh = mlp_reference(x, weights, biases, activation="tanh")
    assert jnp.allclose(out_tanh, ref_tanh, atol=1e-5, rtol=1e-5), "tanh mismatch"

    print("KERNEL_OK")
</pallas_src>

<mosaic_0001>
module attributes {stable_mosaic.version = 11 : i64} {
  func.func @_mlp_kernel(%arg0: i32, %arg1: memref<16x32xf32, #tpu.memory_space<vmem>>, %arg2: memref<32x64xf32, #tpu.memory_space<vmem>>, %arg3: memref<1x64xf32, #tpu.memory_space<vmem>>, %arg4: memref<64x64xf32, #tpu.memory_space<vmem>>, %arg5: memref<1x64xf32, #tpu.memory_space<vmem>>, %arg6: memref<64x128xf32, #tpu.memory_space<vmem>>, %arg7: memref<1x128xf32, #tpu.memory_space<vmem>>, %arg8: memref<16x128xf32, #tpu.memory_space<vmem>>) attributes {dimension_semantics = [#tpu.dimension_semantics<parallel>], iteration_bounds = array<i64: 1>, scalar_prefetch = 0 : i64, scratch_operands = 0 : i64, tpu.core_type = #tpu.core_type<tc>, window_params = [{transform_indices = @transform_0, window_bounds = array<i64: 16, 32>}, {pipeline_mode = #tpu.pipeline_mode<synchronous>, transform_indices = @transform_1, window_bounds = array<i64: 32, 64>}, {pipeline_mode = #tpu.pipeline_mode<synchronous>, transform_indices = @transform_2, window_bounds = array<i64: 1, 64>}, {pipeline_mode = #tpu.pipeline_mode<synchronous>, transform_indices = @transform_3, window_bounds = array<i64: 64, 64>}, {pipeline_mode = #tpu.pipeline_mode<synchronous>, transform_indices = @transform_4, window_bounds = array<i64: 1, 64>}, {pipeline_mode = #tpu.pipeline_mode<synchronous>, transform_indices = @transform_5, window_bounds = array<i64: 64, 128>}, {pipeline_mode = #tpu.pipeline_mode<synchronous>, transform_indices = @transform_6, window_bounds = array<i64: 1, 128>}, {transform_indices = @transform_7, window_bounds = array<i64: 16, 128>}]} {
    %c0 = arith.constant 0 : index
    %c0_0 = arith.constant 0 : index
    %0 = vector.load %arg1[%c0, %c0_0] : memref<16x32xf32, #tpu.memory_space<vmem>>, vector<16x32xf32>
    %c0_1 = arith.constant 0 : index
    %c0_2 = arith.constant 0 : index
    %1 = vector.load %arg2[%c0_1, %c0_2] : memref<32x64xf32, #tpu.memory_space<vmem>>, vector<32x64xf32>
    %c0_3 = arith.constant 0 : index
    %c0_4 = arith.constant 0 : index
    %2 = vector.load %arg3[%c0_3, %c0_4] : memref<1x64xf32, #tpu.memory_space<vmem>>, vector<1x64xf32>
    %cst = arith.constant dense<0.000000e+00> : vector<16x64xf32>
    %3 = tpu.matmul %0, %1, %cst {dimension_numbers = #tpu.dot_dimension_numbers<[1], [0], [0], [1], [0, 0, 1, 1], [], []>} : vector<16x32xf32>, vector<32x64xf32>, vector<16x64xf32> -> vector<16x64xf32>
    %4 = vector.broadcast %2 : vector<1x64xf32> to vector<16x64xf32>
    %5 = arith.addf %3, %4 : vector<16x64xf32>
    %cst_5 = arith.constant 0.000000e+00 : f32
    %6 = vector.broadcast %cst_5 : f32 to vector<16x64xf32>
    %7 = arith.maximumf %5, %6 : vector<16x64xf32>
    %c0_6 = arith.constant 0 : index
    %c0_7 = arith.constant 0 : index
    %8 = vector.load %arg4[%c0_6, %c0_7] : memref<64x64xf32, #tpu.memory_space<vmem>>, vector<64x64xf32>
    %c0_8 = arith.constant 0 : index
    %c0_9 = arith.constant 0 : index
    %9 = vector.load %arg5[%c0_8, %c0_9] : memref<1x64xf32, #tpu.memory_space<vmem>>, vector<1x64xf32>
    %cst_10 = arith.constant dense<0.000000e+00> : vector<16x64xf32>
    %10 = tpu.matmul %7, %8, %cst_10 {dimension_numbers = #tpu.dot_dimension_numbers<[1], [0], [0], [1], [0, 0, 1, 1], [], []>} : vector<16x64xf32>, vector<64x64xf32>, vector<16x64xf32> -> vector<16x64xf32>
    %11 = vector.broadcast %9 : vector<1x64xf32> to vector<16x64xf32>
    %12 = arith.addf %10, %11 : vector<16x64xf32>
    %cst_11 = arith.constant 0.000000e+00 : f32
    %13 = vector.broadcast %cst_11 : f32 to vector<16x64xf32>
    %14 = arith.maximumf %12, %13 : vector<16x64xf32>
    %c0_12 = arith.constant 0 : index
    %c0_13 = arith.constant 0 : index
    %15 = vector.load %arg6[%c0_12, %c0_13] : memref<64x128xf32, #tpu.memory_space<vmem>>, vector<64x128xf32>
    %c0_14 = arith.constant 0 : index
    %c0_15 = arith.constant 0 : index
    %16 = vector.load %arg7[%c0_14, %c0_15] : memref<1x128xf32, #tpu.memory_space<vmem>>, vector<1x128xf32>
    %cst_16 = arith.constant dense<0.000000e+00> : vector<16x128xf32>
    %17 = tpu.matmul %14, %15, %cst_16 {dimension_numbers = #tpu.dot_dimension_numbers<[1], [0], [0], [1], [0, 0, 1, 1], [], []>} : vector<16x64xf32>, vector<64x128xf32>, vector<16x128xf32> -> vector<16x128xf32>
    %18 = vector.broadcast %16 : vector<1x128xf32> to vector<16x128xf32>
    %19 = arith.addf %17, %18 : vector<16x128xf32>
    %c0_17 = arith.constant 0 : index
    %c0_18 = arith.constant 0 : index
    %20 = vector.load %arg8[%c0_17, %c0_18] : memref<16x128xf32, #tpu.memory_space<vmem>>, vector<16x128xf32>
    tpu.vector_store %arg8[%c0_17, %c0_18], %19 {strides = array<i32>} : memref<16x128xf32, #tpu.memory_space<vmem>>, vector<16x128xf32>,
    return
  }
  func.func @transform_0(%arg0: i32) -> (i32, i32) {
    %c0_i32 = arith.constant 0 : i32
    %c0_i32_0 = arith.constant 0 : i32
    return %arg0, %c0_i32 : i32, i32
  }
  func.func @transform_1(%arg0: i32) -> (i32, i32) {
    %c0_i32 = arith.constant 0 : i32
    %c0_i32_0 = arith.constant 0 : i32
    %c0_i32_1 = arith.constant 0 : i32
    return %c0_i32, %c0_i32_0 : i32, i32
  }
  func.func @transform_2(%arg0: i32) -> (i32, i32) {
    %c0_i32 = arith.constant 0 : i32
    %c0_i32_0 = arith.constant 0 : i32
    %c0_i32_1 = arith.constant 0 : i32
    return %c0_i32, %c0_i32_0 : i32, i32
  }
  func.func @transform_3(%arg0: i32) -> (i32, i32) {
    %c0_i32 = arith.constant 0 : i32
    %c0_i32_0 = arith.constant 0 : i32
    %c0_i32_1 = arith.constant 0 : i32
    return %c0_i32, %c0_i32_0 : i32, i32
  }
  func.func @transform_4(%arg0: i32) -> (i32, i32) {
    %c0_i32 = arith.constant 0 : i32
    %c0_i32_0 = arith.constant 0 : i32
    %c0_i32_1 = arith.constant 0 : i32
    return %c0_i32, %c0_i32_0 : i32, i32
  }
  func.func @transform_5(%arg0: i32) -> (i32, i32) {
    %c0_i32 = arith.constant 0 : i32
    %c0_i32_0 = arith.constant 0 : i32
    %c0_i32_1 = arith.constant 0 : i32
    return %c0_i32, %c0_i32_0 : i32, i32
  }
  func.func @transform_6(%arg0: i32) -> (i32, i32) {
    %c0_i32 = arith.constant 0 : i32
    %c0_i32_0 = arith.constant 0 : i32
    %c0_i32_1 = arith.constant 0 : i32
    return %c0_i32, %c0_i32_0 : i32, i32
  }
  func.func @transform_7(%arg0: i32) -> (i32, i32) {
    %c0_i32 = arith.constant 0 : i32
    %c0_i32_0 = arith.constant 0 : i32
    return %arg0, %c0_i32 : i32, i32
  }
}

</mosaic_0001>

<bundles_post_ra>
// kernel: tpu_custom_call.1
= control target key start
LH: loop header
LB: loop body
LE: loop exit
PB: predicated region body
PF: predicated region fallthrough
CT: control target
= control target key end

     0   :  { %12 = vsyncpa [#allocation3], 0  ;;  %s795_s0 = inlined_call_operand.hbm [shape: f32[16,32], index: 0, kind: input, shape index: {}]   ;;  %s796_s1 = inlined_call_operand.hbm [shape: f32[32,64], index: 1, kind: input, shape index: {}]   ;;  %s797_s2 = inlined_call_operand.vmem [shape: f32[1,64], index: 2, kind: input, shape index: {}]   ;;  %s798_s3 = inlined_call_operand.hbm [shape: f32[64,64], index: 3, kind: input, shape index: {}]   ;;  %s799_s4 = inlined_call_operand.vmem [shape: f32[1,64], index: 4, kind: input, shape index: {}]   ;;  %s800_s5 = inlined_call_operand.hbm [shape: f32[64,128], index: 5, kind: input, shape index: {}]   ;;  %s801_s6 = inlined_call_operand.vmem [shape: f32[1,128], index: 6, kind: input, shape index: {}]   ;;  %s802_s7 = inlined_call_operand.hbm [shape: f32[16,128], index: 7, kind: output, shape index: {}]  }
   0x1   :  { %13 = vsyncpa [#allocation6], 0 }
   0x2   :  { %14 = vsyncpa [#allocation9], 0 }
   0x3   :  { %15 = vsyncpa [#allocation4], 0  ;;  %s644_s24 = smov [#allocation5]   ;;  %s645_s26 = smov [#allocation2]  }
   0x4   :  { %s33_s25 = sshll.u32 %s644_s24, 4  ;;  %s21_s27 = sshll.u32 %s645_s26, 4  ;;  %s34_s25 = int_to_ptr.vmem [resolvable:$true] %s33_s25  ;;  %s691_s27 = int_to_ptr.vmem [resolvable:$true] %s21_s27 }
   0x5   :  { %s526_s30 = scalar_lea.hbm %s796_s1, 512 }
   0x6   :  { %p527_p0 = scmp.ne.s32.totalorder %s796_s1, %s526_s30  ;;  %p530_p1 = scmp.lt.u32.totalorder %s526_s30, %s796_s1 }
   0x8   :  { %p532_p2 = pnand %p530_p1, %p527_p0 }
   0xa   :  { %535 = shalt.err (!%p532_p2)
}
   0xb   :  { %s536_s12 = scalar_lea.vmem %s34_s25, 512  ;;  %p541_p4 = scmp.lt.s32.totalorder %s34_s25, %s34_s25 }
   0xc   :  { %p537_p3 = scmp.ne.s32.totalorder %s34_s25, %s536_s12  ;;  %p542_p5 = scmp.lt.s32.totalorder %s536_s12, %s536_s12 }
   0xe   :  { %p543_p6 = por %p542_p5, %p541_p4 }
  0x10   :  { %p544_p7 = pnand %p543_p6, %p537_p3 }
  0x12   :  { %547 = shalt.err (!%p544_p7)
}
  0x13   :  { %s646_s13 = smov 128   ;;  %s647_s14 = smov 8  }
  0x14   :  { %39 = dma.hbm_to_vmem [thread:$0]  %s796_s1, 512, %s34_s25, [#allocation6], %s646_s13, %s646_s13, %s647_s14  }
  0x15   :  { %s548_s19 = scalar_lea.hbm %s795_s0, 256 }
  0x16   :  { %p549_p8 = scmp.ne.s32.totalorder %s795_s0, %s548_s19  ;;  %p552_p9 = scmp.lt.u32.totalorder %s548_s19, %s795_s0 }
  0x18   :  { %p554_p10 = pnand %p552_p9, %p549_p8 }
  0x1a   :  { %557 = shalt.err (!%p554_p10)
}
  0x1b   :  { %s558_s24 = scalar_lea.vmem %s691_s27, 256  ;;  %p563_p12 = scmp.lt.s32.totalorder %s691_s27, %s691_s27 }
  0x1c   :  { %p559_p11 = scmp.ne.s32.totalorder %s691_s27, %s558_s24  ;;  %p564_p13 = scmp.lt.s32.totalorder %s558_s24, %s558_s24 }
  0x1e   :  { %p565_p0 = por %p564_p13, %p563_p12 }
  0x20   :  { %p566_p1 = pnand %p565_p0, %p559_p11 }
  0x22   :  { %569 = shalt.err (!%p566_p1)
}
  0x23   :  { %27 = dma.hbm_to_vmem [thread:$0]  %s795_s0, 256, %s691_s27, [#allocation3], %s646_s13, %s646_s13, %s647_s14  }
  0x24   :  { %s648_s26 = smov [#allocation7]   ;;  %s649_s29 = smov [#allocation8]  }
  0x25   :  { %s47_s28 = sshll.u32 %s648_s26, 4  ;;  %s61_s30 = sshll.u32 %s649_s29, 4  ;;  %s48_s28 = int_to_ptr.vmem [resolvable:$true] %s47_s28  ;;  %s728_s30 = int_to_ptr.vmem [resolvable:$true] %s61_s30 }
  0x26   :  { %s570_s10 = scalar_lea.hbm %s798_s3, 1024 }
  0x27   :  { %p571_p2 = scmp.ne.s32.totalorder %s798_s3, %s570_s10  ;;  %p574_p3 = scmp.lt.u32.totalorder %s570_s10, %s798_s3 }
  0x29   :  { %p576_p4 = pnand %p574_p3, %p571_p2 }
  0x2b   :  { %579 = shalt.err (!%p576_p4)
}
  0x2c   :  { %s580_s0 = scalar_lea.vmem %s48_s28, 1024  ;;  %p585_p6 = scmp.lt.s32.totalorder %s48_s28, %s48_s28 }
  0x2d   :  { %p581_p5 = scmp.ne.s32.totalorder %s48_s28, %s580_s0  ;;  %p586_p7 = scmp.lt.s32.totalorder %s580_s0, %s580_s0 }
  0x2f   :  { %p587_p8 = por %p586_p7, %p585_p6 }
  0x31   :  { %p588_p9 = pnand %p587_p8, %p581_p5 }
  0x33   :  { %591 = shalt.err (!%p588_p9)
}
  0x34   :  { %53 = dma.hbm_to_vmem [thread:$0]  %s798_s3, 1024, %s48_s28, [#allocation6], %s646_s13, %s646_s13, %s647_s14  }
  0x35   :  { %s592_s20 = scalar_lea.hbm %s800_s5, 1024 }
  0x36   :  { %p593_p10 = scmp.ne.s32.totalorder %s800_s5, %s592_s20  ;;  %p596_p11 = scmp.lt.u32.totalorder %s592_s20, %s800_s5 }
  0x38   :  { %p598_p12 = pnand %p596_p11, %p593_p10 }
  0x3a   :  { %601 = shalt.err (!%p598_p12)
}
  0x3b   :  { %s602_s1 = scalar_lea.vmem %s728_s30, 1024  ;;  %p607_p0 = scmp.lt.s32.totalorder %s728_s30, %s728_s30 }
  0x3c   :  { %p603_p13 = scmp.ne.s32.totalorder %s728_s30, %s602_s1  ;;  %p608_p1 = scmp.lt.s32.totalorder %s602_s1, %s602_s1 }
  0x3e   :  { %p609_p2 = por %p608_p1, %p607_p0 }
  0x40   :  { %p610_p3 = pnand %p609_p2, %p603_p13 }
  0x42   :  { %613 = shalt.err (!%p610_p3)
}
  0x43   :  { %67 = dma.hbm_to_vmem [thread:$0]  %s800_s5, 1024, %s728_s30, [#allocation9], %s646_s13, %s646_s13, %s647_s14  }
  0x44   :  { %636 = dma.done.wait [#allocation3], 256  }
  0x45   :  { %637 = vsyncadd [#allocation3], 4294967040 }
  0x46   :  { %638 = dma.done.wait [#allocation6], 1536  }
  0x47   :  { %639 = vsyncadd [#allocation6], 4294965760 }
  0x48   :  { %640 = dma.done.wait [#allocation9], 1024  }
  0x49   :  { %641 = vsyncadd [#allocation9], 4294966272  ;;  %vm95_vm0 = vcmask 261120   ;;  %v84_v0 = vld [vmem:[#allocation5] sm:$0xff]  ;;  %v85_v1 = vld [vmem:[#allocation5 + $0x8] sm:$0xff]  ;;  %vm194_vm1 = vcmask 523264  }
  0x4a   :  { %v86_v2 = vld [vmem:[#allocation5 + $0x10] sm:$0xff]  ;;  %v479_v3 = vpack.c.bf16 %v85_v1, %v84_v0  ;;  %v87_v4 = vld [vmem:[#allocation5 + $0x18] sm:$0xff]  ;;  %v179_v7 = vld [vmem:[#allocation7] sm:$0xff]  ;;  %s650_s8 = smov [#allocation10]  }
  0x4b   :  { %v82_v5 = vld [vmem:[#allocation2] sm:$0xff]  ;;  %v483_v6 = vpack.c.bf16 %v87_v4, %v86_v2  ;;  %v180_v8 = vld [vmem:[#allocation7 + $0x8] sm:$0xff]  ;;  %v182_v11 = vld [vmem:[#allocation7 + $0x18] sm:$0xff]  ;;  %s381_s9 = sshll.u32 %s650_s8, 4  ;;  %s382_s9 = int_to_ptr.vmem [resolvable:$true] %s381_s9 }
  0x4c   :  { %438 = vmatprep.mubr.msk.f32.mxu0 %vm95_vm0, %v82_v5  ;;  %v181_v9 = vld [vmem:[#allocation7 + $0x10] sm:$0xff]  ;;  %480 = vmatprep.subr.bf16.mxu0 %v479_v3  ;;  %v487_v10 = vpack.c.bf16 %v180_v8, %v179_v7  ;;  %v183_v13 = vld [vmem:[#allocation7 + $0x20] sm:$0xff]  ;;  %v184_v14 = vld [vmem:[#allocation7 + $0x28] sm:$0xff]  ;;  %p619_p5 = scmp.lt.s32.totalorder %s382_s9, %s382_s9 }
  0x4d   :  { %482 = vmatpush3.bf16.msra.mxu0 %v479_v3  ;;  %v491_v12 = vpack.c.bf16 %v182_v11, %v181_v9  ;;  %v495_v15 = vpack.c.bf16 %v184_v14, %v183_v13  ;;  %v83_v16 = vld [vmem:[#allocation2 + $0x8] sm:$0xff]  ;;  %v185_v17 = vld [vmem:[#allocation7 + $0x30] sm:$0xff]  ;;  %v278_v20 = vld [vmem:[#allocation8] sm:$0xff] }
  0x4e   :  { %484 = vmatprep.subr.bf16.mxu0 %v483_v6  ;;  %488 = vmatprep.subr.bf16.mxu1 %v487_v10  ;;  %v186_v18 = vld [vmem:[#allocation7 + $0x38] sm:$0xff]  ;;  %v279_v21 = vld [vmem:[#allocation8 + $0x8] sm:$0xff]  ;;  %v280_v22 = vld [vmem:[#allocation8 + $0x10] sm:$0xff] }
  0x4f   :  { %490 = vmatpush3.bf16.msra.mxu1 %v487_v10  ;;  %v499_v19 = vpack.c.bf16 %v186_v18, %v185_v17  ;;  %v503_v23 = vpack.c.bf16 %v279_v21, %v278_v20  ;;  %v281_v24 = vld [vmem:[#allocation8 + $0x18] sm:$0xff]  ;;  %v282_v26 = vld [vmem:[#allocation8 + $0x20] sm:$0xff]  ;;  %v283_v27 = vld [vmem:[#allocation8 + $0x28] sm:$0xff] }
  0x50   :  { %492 = vmatprep.subr.bf16.mxu1 %v491_v12  ;;  %v507_v25 = vpack.c.bf16 %v281_v24, %v280_v22  ;;  %v511_v28 = vpack.c.bf16 %v283_v27, %v282_v26  ;;  %v395_v29 = vld [vmem:[%s797_s2] ss:$0 sm:$0xff]  ;;  %v285_v37 = vld [vmem:[#allocation8 + $0x38] sm:$0xff] }
  0x51   :  { %486 = vmatpush3.bf16.msra.mxu0 %v483_v6  ;;  %v284_v36 = vld [vmem:[#allocation8 + $0x30] sm:$0xff] }
  0x52   :  { %504 = vmatprep.subr.bf16.mxu0 %v503_v23  ;;  %v515_v38 = vpack.c.bf16 %v285_v37, %v284_v36  ;;  %v398_v39 = vld [vmem:[%s799_s4] ss:$0 sm:$0xff]  ;;  %s614_s4 = scalar_lea.vmem %s382_s9, 256 }
  0x53   :  { %494 = vmatpush3.bf16.msra.mxu1 %v491_v12  ;;  %v401_v46 = vld [vmem:[%s801_s6] ss:$0 sm:$0xff]  ;;  %p615_p4 = scmp.ne.s32.totalorder %s382_s9, %s614_s4  ;;  %p620_p6 = scmp.lt.s32.totalorder %s614_s4, %s614_s4 }
  0x54   :  { %439 = vmatmul.mubr.msk.f32.vlgmr.msra.gmra.mrb[0].mxu0 %vm95_vm0, %v83_v16  ;;  %496 = vmatprep.subr.bf16.mxu1 %v495_v15 }
  0x55   :  { %506 = vmatpush3.bf16.msra.mxu0 %v503_v23  ;;  %p621_p7 = por %p620_p6, %p619_p5 }
  0x56   :  { %508 = vmatprep.subr.bf16.mxu0 %v507_v25 }
  0x57   :  { %498 = vmatpush3.bf16.msra.mxu1 %v495_v15  ;;  %p622_p8 = pnand %p621_p7, %p615_p4 }
  0x58   :  { %500 = vmatprep.subr.bf16.mxu1 %v499_v19 }
  0x59   :  { %510 = vmatpush3.bf16.msra.mxu0 %v507_v25 }
  0x5a   :  { %512 = vmatprep.subr.bf16.mxu0 %v511_v28 }
  0x5b   :  { %502 = vmatpush3.bf16.msra.mxu1 %v499_v19 }
  0x5d   :  { %514 = vmatpush3.bf16.msra.mxu0 %v511_v28 }
  0x5e   :  { %516 = vmatprep.subr.bf16.mxu0 %v515_v38 }
  0x61   :  { %518 = vmatpush3.bf16.msra.mxu0 %v515_v38 }
 0x127   :  { %v440_v30 = vpop.f32.mrb[0].mxu0 }
 0x128   :  { %v174_v31 = vadd.f32 %v440_v30, %v395_v29  ;;  %v168_v32 = vpop.f32.mrb[1].mxu0 }
 0x129   :  { %v169_v33 = vadd.f32 %v395_v29, %v168_v32 }
 0x12a   :  { %v178_v35 = vmax.f32 %v174_v31, 0.0 }
 0x12b   :  { %v177_v34 = vmax.f32 %v169_v33, 0.0 }
 0x12d   :  { %457 = vmatprep.mubr.msk.f32.mxu1 %vm194_vm1, %v177_v34 }
 0x12e   :  { %458 = vmatmul.mubr.msk.f32.vlgmr.msra.gmra.mrb[0].mxu1 %vm194_vm1, %v178_v35 }
 0x201   :  { %v459_v40 = vpop.f32.mrb[0].mxu1 }
 0x202   :  { %v273_v41 = vadd.f32 %v459_v40, %v398_v39  ;;  %v267_v42 = vpop.f32.mrb[1].mxu1 }
 0x203   :  { %v268_v43 = vadd.f32 %v398_v39, %v267_v42 }
 0x204   :  { %v277_v45 = vmax.f32 %v273_v41, 0.0 }
 0x205   :  { %v276_v44 = vmax.f32 %v268_v43, 0.0 }
 0x207   :  { %476 = vmatprep.mubr.msk.f32.mxu0 %vm194_vm1, %v276_v44 }
 0x208   :  { %477 = vmatmul.mubr.msk.f32.vlgmr.msra.gmra.mrb[2].mxu0 %vm194_vm1, %v277_v45 }
 0x2db   :  { %v478_v47 = vpop.f32.mrb[2].mxu0 }
 0x2dc   :  { %v371_v48 = vadd.f32 %v478_v47, %v401_v46  ;;  %v365_v49 = vpop.f32.mrb[3].mxu0 }
 0x2dd   :  { %v366_v50 = vadd.f32 %v401_v46, %v365_v49 }
 0x2de   :  { %375 = vst [vmem:[#allocation10 + $0x8] sm:$0xff] %v371_v48 }
 0x2df   :  { %374 = vst [vmem:[#allocation10] sm:$0xff] %v366_v50 }
 0x2e0   :  { %625 = shalt.err (!%p622_p8)
}
 0x2e1   :  { %s626_s6 = scalar_lea.hbm %s802_s7, 256 }
 0x2e2   :  { %p627_p9 = scmp.ne.s32.totalorder %s802_s7, %s626_s6  ;;  %p630_p10 = scmp.lt.u32.totalorder %s626_s6, %s802_s7 }
 0x2e4   :  { %p632_p11 = pnand %p630_p10, %p627_p9 }
 0x2e6   :  { %635 = shalt.err (!%p632_p11)
}
 0x2e7   :  { %387 = dma.vmem_to_hbm [thread:$0]  %s382_s9, 256, %s802_s7, [#allocation4], %s646_s13, %s646_s13, %s647_s14  }
 0x2e8   :  { %642 = dma.done.wait [#allocation4], 256  }
 0x2e9   :  { %643 = vsyncadd [#allocation4], 4294967040 }
 0x2ea   :  { %391 = vsyncpa [#allocation3], 1 }
 0x2eb   :  { %392 = vsyncpa [#allocation6], 1 }
 0x2ec   :  { %393 = vsyncpa [#allocation9], 1 }
 0x2ed   :  { %394 = vsyncpa [#allocation4], 1 }

</bundles_post_ra>
